<compile_context>
chip_gen: v6e
topology: v6e:2x2x1
jax: 0.10.0
libtpu: 0.0.40
codegen_flags: <defaults>
</compile_context>

<pallas_src>
import jax
import jax.numpy as jnp
from jax.experimental import pallas as pl
from jax.experimental.pallas import tpu as pltpu

TELU_ALPHA1 = 0.15
TELU_ALPHA2 = 0.10
BN_EPS = 1e-5
LANE = 128  # pad hidden / output feature dims to a full vreg lane width


def _telu(x, alpha):
    # Module's custom "TeLU": where(x >= 0, x, alpha * (exp(x) - 1)).
    return jnp.where(x >= 0, x, alpha * (jnp.exp(x) - 1.0))


def _round_up(a, m):
    return ((a + m - 1) // m) * m


def ffnn_kernel(x_ref, w1_ref, b1_ref, w2_ref, b2_ref, w3_ref, b3_ref, o_ref):
    # bf16 MXU operands, f32 accumulation; biases / activations stay f32.
    x = x_ref[...].astype(jnp.bfloat16)

    # fc1 + bn1 (folded) + TeLU(0.15); Dropout is identity in eval mode.
    h1 = jnp.dot(x, w1_ref[...], preferred_element_type=jnp.float32) + b1_ref[...]
    h1 = _telu(h1, TELU_ALPHA1)          # padded lanes stay exactly 0

    # fc2 + bn2 (folded) + TeLU(0.10); Dropout is identity in eval mode.
    h2 = jnp.dot(h1.astype(jnp.bfloat16), w2_ref[...],
                 preferred_element_type=jnp.float32) + b2_ref[...]
    h2 = _telu(h2, TELU_ALPHA2)

    # fc3 (output columns 2..127 are exact zeros; sliced away in the wrapper).
    o = jnp.dot(h2.astype(jnp.bfloat16), w3_ref[...],
                preferred_element_type=jnp.float32) + b3_ref[...]
    o_ref[...] = o.astype(o_ref.dtype)


def fold_params(params):
    """Fold BN into the Linears, pad feature dims to 128 lanes, cast W to bf16."""

    def fold(w, b, gamma, beta, mean, var):
        s = gamma / jnp.sqrt(var + BN_EPS)
        w_f = (w * s[:, None]).T.astype(jnp.float32)          # (in, out)
        b_f = (b * s + beta - mean * s).astype(jnp.float32)   # (out,)
        return w_f, b_f

    w1, b1 = fold(params["fc1_w"], params["fc1_b"], params["bn1_gamma"],
                  params["bn1_beta"], params["bn1_mean"], params["bn1_var"])
    w2, b2 = fold(params["fc2_w"], params["fc2_b"], params["bn2_gamma"],
                  params["bn2_beta"], params["bn2_mean"], params["bn2_var"])
    w3 = params["fc3_w"].T.astype(jnp.float32)                # (64, 2)
    b3 = params["fc3_b"].astype(jnp.float32)                  # (2,)

    def pad_cols(w):
        return jnp.pad(w, ((0, 0), (0, LANE - w.shape[1])))

    def pad_rows(w):
        return jnp.pad(w, ((0, LANE - w.shape[0]), (0, 0)))

    def pad_vec(b):
        return jnp.pad(b, (0, LANE - b.shape[0]))[None, :]

    w1 = pad_cols(w1)                 # (D,   128)
    w2 = pad_cols(pad_rows(w2))       # (128, 128)
    w3 = pad_cols(pad_rows(w3))       # (128, 128)
    b1, b2, b3 = pad_vec(b1), pad_vec(b2), pad_vec(b3)   # (1, 128) each, f32

    return (w1.astype(jnp.bfloat16), b1,
            w2.astype(jnp.bfloat16), b2,
            w3.astype(jnp.bfloat16), b3)


def ffnn_forward(x, params, c_out=2):
    """Eval-mode FFNN forward.

    x: (N, D) float array (f32 or bf16 -- DMA'd in native dtype).
    params: PyTorch-layout tensors: fc{1,2,3}_w (out,in), fc{1,2,3}_b (out,),
            bn{1,2}_gamma/beta/mean/var (features,).
    Returns (N, c_out) float32 logits.
    """
    n, d = x.shape
    w1, b1, w2, b2, w3, b3 = fold_params(params)

    # --- batch tile -------------------------------------------------------
    sub = 16 if x.dtype == jnp.bfloat16 else 8        # sublane alignment of x tile
    in_row = d * x.dtype.itemsize
    out_row = LANE * 4
    # keep the double-buffered (input + output) blocks well inside scoped VMEM
    budget_rows = (5 * 1024 * 1024) // (in_row + out_row)
    tn = min(8192, budget_rows, _round_up(n, sub))
    tn = max(sub, (tn // sub) * sub)
    # v7x has 2 TensorCores: keep >= 2 grid steps when the batch is large enough
    if n >= 4 * sub:
        tn = min(tn, _round_up(pl.cdiv(n, 2), sub))

    n_pad = _round_up(n, tn)
    if n_pad != n:
        # Rows are independent (no reduction), so zero-padded rows are exact
        # and simply sliced away below.
        x = jnp.pad(x, ((0, n_pad - n), (0, 0)))

    weight_bytes = sum(a.size * a.dtype.itemsize
                       for a in (w1, b1, w2, b2, w3, b3))
    cost = pl.CostEstimate(
        flops=2 * n_pad * (d * LANE + LANE * LANE + LANE * LANE),
        transcendentals=n_pad * 2 * LANE,
        bytes_accessed=n_pad * in_row + n_pad * out_row + weight_bytes,
    )

    out = pl.pallas_call(
        ffnn_kernel,
        out_shape=jax.ShapeDtypeStruct((n_pad, LANE), jnp.float32),
        grid=(n_pad // tn,),
        in_specs=[
            pl.BlockSpec((tn, d), lambda i: (i, 0)),        # x tile (pipelined)
            pl.BlockSpec((d, LANE), lambda i: (0, 0)),      # folded W1 (resident)
            pl.BlockSpec((1, LANE), lambda i: (0, 0)),      # folded b1
            pl.BlockSpec((LANE, LANE), lambda i: (0, 0)),   # folded W2
            pl.BlockSpec((1, LANE), lambda i: (0, 0)),      # folded b2
            pl.BlockSpec((LANE, LANE), lambda i: (0, 0)),   # padded W3
            pl.BlockSpec((1, LANE), lambda i: (0, 0)),      # padded b3
        ],
        out_specs=pl.BlockSpec((tn, LANE), lambda i: (i, 0)),  # lane-dense output
        compiler_params=pltpu.CompilerParams(
            dimension_semantics=("parallel",),
            vmem_limit_bytes=32 * 1024 * 1024,
        ),
        cost_estimate=cost,
    )(x, w1, b1, w2, b2, w3, b3)

    return out[:n, :c_out]


if __name__ == "__main__":
    key = jax.random.PRNGKey(0)
    ks = jax.random.split(key, 16)

    N, D = 64, 16          # batch=64, input_size=16
    H1, H2, C = 32, 64, 2  # fixed by the module definition

    x = jax.random.normal(ks[0], (N, D), dtype=jnp.float32)

    params = {
        "fc1_w": 0.3 * jax.random.normal(ks[1], (H1, D), jnp.float32),
        "fc1_b": 0.1 * jax.random.normal(ks[2], (H1,), jnp.float32),
        "bn1_gamma": 1.0 + 0.1 * jax.random.normal(ks[3], (H1,), jnp.float32),
        "bn1_beta": 0.1 * jax.random.normal(ks[4], (H1,), jnp.float32),
        "bn1_mean": 0.1 * jax.random.normal(ks[5], (H1,), jnp.float32),
        "bn1_var": jax.random.uniform(ks[6], (H1,), jnp.float32, 0.5, 1.5),
        "fc2_w": 0.3 * jax.random.normal(ks[7], (H2, H1), jnp.float32),
        "fc2_b": 0.1 * jax.random.normal(ks[8], (H2,), jnp.float32),
        "bn2_gamma": 1.0 + 0.1 * jax.random.normal(ks[9], (H2,), jnp.float32),
        "bn2_beta": 0.1 * jax.random.normal(ks[10], (H2,), jnp.float32),
        "bn2_mean": 0.1 * jax.random.normal(ks[11], (H2,), jnp.float32),
        "bn2_var": jax.random.uniform(ks[12], (H2,), jnp.float32, 0.5, 1.5),
        "fc3_w": 0.3 * jax.random.normal(ks[13], (C, H2), jnp.float32),
        "fc3_b": 0.1 * jax.random.normal(ks[14], (C,), jnp.float32),
    }

    out = ffnn_forward(x, params)
    jax.block_until_ready(out)
    assert out.shape == (N, C), out.shape

    # --- Tight check: exact kernel semantics (folded BN, bf16 MXU operands,
    #     f32 accumulation) reproduced in plain JAX. ---
    w1, b1, w2, b2, w3, b3 = fold_params(params)

    def kernel_semantics_ref(xr):
        h1 = jnp.dot(xr.astype(jnp.bfloat16), w1,
                     preferred_element_type=jnp.float32) + b1
        h1 = _telu(h1, TELU_ALPHA1)
        h2 = jnp.dot(h1.astype(jnp.bfloat16), w2,
                     preferred_element_type=jnp.float32) + b2
        h2 = _telu(h2, TELU_ALPHA2)
        o = jnp.dot(h2.astype(jnp.bfloat16), w3,
                    preferred_element_type=jnp.float32) + b3
        return o[:, :C]

    ref_bf16 = kernel_semantics_ref(x)
    assert jnp.allclose(out, ref_bf16, atol=1e-2, rtol=1e-2)

    # --- Sanity check vs the exact f32 eval-mode module forward (loose
    #     tolerance accounts only for bf16 weight/activation quantization). ---
    def module_ref(xr):
        def bn(y, g, b, m, v):
            return (y - m) / jnp.sqrt(v + BN_EPS) * g + b

        y = xr @ params["fc1_w"].T + params["fc1_b"]
        y = _telu(bn(y, params["bn1_gamma"], params["bn1_beta"],
                     params["bn1_mean"], params["bn1_var"]), TELU_ALPHA1)
        y = y @ params["fc2_w"].T + params["fc2_b"]
        y = _telu(bn(y, params["bn2_gamma"], params["bn2_beta"],
                     params["bn2_mean"], params["bn2_var"]), TELU_ALPHA2)
        return y @ params["fc3_w"].T + params["fc3_b"]

    ref = module_ref(x)
    scale = float(jnp.max(jnp.abs(ref)))
    max_err = float(jnp.max(jnp.abs(out - ref)))
    assert max_err <= 0.05 * scale + 0.1, (max_err, scale)

    print("KERNEL_OK")
</pallas_src>

<mosaic_0001>
module attributes {stable_mosaic.version = 11 : i64} {
  func.func @ffnn_kernel(%arg0: i32, %arg1: memref<32x16xf32, #tpu.memory_space<vmem>>, %arg2: memref<16x128xbf16, #tpu.memory_space<vmem>>, %arg3: memref<1x128xf32, #tpu.memory_space<vmem>>, %arg4: memref<128x128xbf16, #tpu.memory_space<vmem>>, %arg5: memref<1x128xf32, #tpu.memory_space<vmem>>, %arg6: memref<128x128xbf16, #tpu.memory_space<vmem>>, %arg7: memref<1x128xf32, #tpu.memory_space<vmem>>, %arg8: memref<32x128xf32, #tpu.memory_space<vmem>>) attributes {dimension_semantics = [#tpu.dimension_semantics<parallel>], iteration_bounds = array<i64: 2>, scalar_prefetch = 0 : i64, scratch_operands = 0 : i64, tpu.core_type = #tpu.core_type<tc>, window_params = [{transform_indices = @transform_0, window_bounds = array<i64: 32, 16>}, {pipeline_mode = #tpu.pipeline_mode<synchronous>, transform_indices = @transform_1, window_bounds = array<i64: 16, 128>}, {pipeline_mode = #tpu.pipeline_mode<synchronous>, transform_indices = @transform_2, window_bounds = array<i64: 1, 128>}, {pipeline_mode = #tpu.pipeline_mode<synchronous>, transform_indices = @transform_3, window_bounds = array<i64: 128, 128>}, {pipeline_mode = #tpu.pipeline_mode<synchronous>, transform_indices = @transform_4, window_bounds = array<i64: 1, 128>}, {pipeline_mode = #tpu.pipeline_mode<synchronous>, transform_indices = @transform_5, window_bounds = array<i64: 128, 128>}, {pipeline_mode = #tpu.pipeline_mode<synchronous>, transform_indices = @transform_6, window_bounds = array<i64: 1, 128>}, {transform_indices = @transform_7, window_bounds = array<i64: 32, 128>}]} {
    %c0 = arith.constant 0 : index
    %c0_0 = arith.constant 0 : index
    %0 = vector.load %arg1[%c0, %c0_0] : memref<32x16xf32, #tpu.memory_space<vmem>>, vector<32x16xf32>
    %1 = arith.truncf %0 : vector<32x16xf32> to vector<32x16xbf16>
    %c0_1 = arith.constant 0 : index
    %c0_2 = arith.constant 0 : index
    %2 = vector.load %arg2[%c0_1, %c0_2] : memref<16x128xbf16, #tpu.memory_space<vmem>>, vector<16x128xbf16>
    %cst = arith.constant dense<0.000000e+00> : vector<32x128xf32>
    %3 = tpu.matmul %1, %2, %cst {dimension_numbers = #tpu.dot_dimension_numbers<[1], [0], [0], [1], [0, 0, 1, 1], [], []>} : vector<32x16xbf16>, vector<16x128xbf16>, vector<32x128xf32> -> vector<32x128xf32>
    %c0_3 = arith.constant 0 : index
    %c0_4 = arith.constant 0 : index
    %4 = vector.load %arg3[%c0_3, %c0_4] : memref<1x128xf32, #tpu.memory_space<vmem>>, vector<1x128xf32>
    %5 = vector.broadcast %4 : vector<1x128xf32> to vector<32x128xf32>
    %6 = arith.addf %3, %5 : vector<32x128xf32>
    %cst_5 = arith.constant 0.000000e+00 : f32
    %7 = vector.broadcast %cst_5 : f32 to vector<32x128xf32>
    %8 = arith.cmpf oge, %6, %7 : vector<32x128xf32>
    %9 = math.exp %6 : vector<32x128xf32>
    %cst_6 = arith.constant 1.000000e+00 : f32
    %10 = vector.broadcast %cst_6 : f32 to vector<32x128xf32>
    %11 = arith.subf %9, %10 : vector<32x128xf32>
    %cst_7 = arith.constant 1.500000e-01 : f32
    %12 = vector.broadcast %cst_7 : f32 to vector<32x128xf32>
    %13 = arith.mulf %12, %11 : vector<32x128xf32>
    %14 = arith.select %8, %6, %13 : vector<32x128xi1>, vector<32x128xf32>
    %15 = arith.truncf %14 : vector<32x128xf32> to vector<32x128xbf16>
    %c0_8 = arith.constant 0 : index
    %c0_9 = arith.constant 0 : index
    %16 = vector.load %arg4[%c0_8, %c0_9] : memref<128x128xbf16, #tpu.memory_space<vmem>>, vector<128x128xbf16>
    %cst_10 = arith.constant dense<0.000000e+00> : vector<32x128xf32>
    %17 = tpu.matmul %15, %16, %cst_10 {dimension_numbers = #tpu.dot_dimension_numbers<[1], [0], [0], [1], [0, 0, 1, 1], [], []>} : vector<32x128xbf16>, vector<128x128xbf16>, vector<32x128xf32> -> vector<32x128xf32>
    %c0_11 = arith.constant 0 : index
    %c0_12 = arith.constant 0 : index
    %18 = vector.load %arg5[%c0_11, %c0_12] : memref<1x128xf32, #tpu.memory_space<vmem>>, vector<1x128xf32>
    %19 = vector.broadcast %18 : vector<1x128xf32> to vector<32x128xf32>
    %20 = arith.addf %17, %19 : vector<32x128xf32>
    %cst_13 = arith.constant 0.000000e+00 : f32
    %21 = vector.broadcast %cst_13 : f32 to vector<32x128xf32>
    %22 = arith.cmpf oge, %20, %21 : vector<32x128xf32>
    %23 = math.exp %20 : vector<32x128xf32>
    %cst_14 = arith.constant 1.000000e+00 : f32
    %24 = vector.broadcast %cst_14 : f32 to vector<32x128xf32>
    %25 = arith.subf %23, %24 : vector<32x128xf32>
    %cst_15 = arith.constant 1.000000e-01 : f32
    %26 = vector.broadcast %cst_15 : f32 to vector<32x128xf32>
    %27 = arith.mulf %26, %25 : vector<32x128xf32>
    %28 = arith.select %22, %20, %27 : vector<32x128xi1>, vector<32x128xf32>
    %29 = arith.truncf %28 : vector<32x128xf32> to vector<32x128xbf16>
    %c0_16 = arith.constant 0 : index
    %c0_17 = arith.constant 0 : index
    %30 = vector.load %arg6[%c0_16, %c0_17] : memref<128x128xbf16, #tpu.memory_space<vmem>>, vector<128x128xbf16>
    %cst_18 = arith.constant dense<0.000000e+00> : vector<32x128xf32>
    %31 = tpu.matmul %29, %30, %cst_18 {dimension_numbers = #tpu.dot_dimension_numbers<[1], [0], [0], [1], [0, 0, 1, 1], [], []>} : vector<32x128xbf16>, vector<128x128xbf16>, vector<32x128xf32> -> vector<32x128xf32>
    %c0_19 = arith.constant 0 : index
    %c0_20 = arith.constant 0 : index
    %32 = vector.load %arg7[%c0_19, %c0_20] : memref<1x128xf32, #tpu.memory_space<vmem>>, vector<1x128xf32>
    %33 = vector.broadcast %32 : vector<1x128xf32> to vector<32x128xf32>
    %34 = arith.addf %31, %33 : vector<32x128xf32>
    %c0_21 = arith.constant 0 : index
    %c0_22 = arith.constant 0 : index
    %35 = vector.load %arg8[%c0_21, %c0_22] : memref<32x128xf32, #tpu.memory_space<vmem>>, vector<32x128xf32>
    tpu.vector_store %arg8[%c0_21, %c0_22], %34 {strides = array<i32>} : memref<32x128xf32, #tpu.memory_space<vmem>>, vector<32x128xf32>,
    return
  }
  func.func @transform_0(%arg0: i32) -> (i32, i32) {
    %c0_i32 = arith.constant 0 : i32
    %c0_i32_0 = arith.constant 0 : i32
    return %arg0, %c0_i32 : i32, i32
  }
  func.func @transform_1(%arg0: i32) -> (i32, i32) {
    %c0_i32 = arith.constant 0 : i32
    %c0_i32_0 = arith.constant 0 : i32
    %c0_i32_1 = arith.constant 0 : i32
    return %c0_i32, %c0_i32_0 : i32, i32
  }
  func.func @transform_2(%arg0: i32) -> (i32, i32) {
    %c0_i32 = arith.constant 0 : i32
    %c0_i32_0 = arith.constant 0 : i32
    %c0_i32_1 = arith.constant 0 : i32
    return %c0_i32, %c0_i32_0 : i32, i32
  }
  func.func @transform_3(%arg0: i32) -> (i32, i32) {
    %c0_i32 = arith.constant 0 : i32
    %c0_i32_0 = arith.constant 0 : i32
    %c0_i32_1 = arith.constant 0 : i32
    return %c0_i32, %c0_i32_0 : i32, i32
  }
  func.func @transform_4(%arg0: i32) -> (i32, i32) {
    %c0_i32 = arith.constant 0 : i32
    %c0_i32_0 = arith.constant 0 : i32
    %c0_i32_1 = arith.constant 0 : i32
    return %c0_i32, %c0_i32_0 : i32, i32
  }
  func.func @transform_5(%arg0: i32) -> (i32, i32) {
    %c0_i32 = arith.constant 0 : i32
    %c0_i32_0 = arith.constant 0 : i32
    %c0_i32_1 = arith.constant 0 : i32
    return %c0_i32, %c0_i32_0 : i32, i32
  }
  func.func @transform_6(%arg0: i32) -> (i32, i32) {
    %c0_i32 = arith.constant 0 : i32
    %c0_i32_0 = arith.constant 0 : i32
    %c0_i32_1 = arith.constant 0 : i32
    return %c0_i32, %c0_i32_0 : i32, i32
  }
  func.func @transform_7(%arg0: i32) -> (i32, i32) {
    %c0_i32 = arith.constant 0 : i32
    %c0_i32_0 = arith.constant 0 : i32
    return %arg0, %c0_i32 : i32, i32
  }
}

</mosaic_0001>

<bundles_post_ra>
// kernel: tpu_custom_call.1
= control target key start
LH: loop header
LB: loop body
LE: loop exit
PB: predicated region body
PF: predicated region fallthrough
CT: control target
= control target key end

     0   :  { %12 = vsyncpa [#allocation3], 0  ;;  %s1251_s0 = inlined_call_operand.vmem [shape: f32[64,16], index: 0, kind: input, shape index: {}]   ;;  %s1252_s1 = inlined_call_operand.vmem [shape: bf16[16,128], index: 1, kind: input, shape index: {}]   ;;  %s1253_s2 = inlined_call_operand.vmem [shape: f32[1,128], index: 2, kind: input, shape index: {}]   ;;  %s1254_s3 = inlined_call_operand.vmem [shape: bf16[128,128], index: 3, kind: input, shape index: {}]   ;;  %s1255_s4 = inlined_call_operand.vmem [shape: f32[1,128], index: 4, kind: input, shape index: {}]   ;;  %s1256_s5 = inlined_call_operand.hbm [shape: bf16[128,128], index: 5, kind: input, shape index: {}]   ;;  %s1257_s6 = inlined_call_operand.vmem [shape: f32[1,128], index: 6, kind: input, shape index: {}]   ;;  %s1258_s7 = inlined_call_operand.hbm [shape: f32[64,128], index: 7, kind: output, shape index: {}]  }
   0x1   :  { %13 = vsyncpa [#allocation4], 0 }
   0x2   :  { %15 = vsyncpa [#allocation4 + $0x1], 0  ;;  %s1096_s24 = smov 0   ;;  %s1098_s25 = smov 0  }
   0x3   :  { %s1100_s26 = smov 0   ;;  %s1102_s27 = smov 0  }
   0x4 LB: > { %s1117_s28 = sadd.s32 4294967295, %s1048_s27   ;;  %s757_s29 = sadd.s32 4294967294, %s1048_s27   ;;  %s1048_s27 = sphi %s1102_s27, %s1266_s27   ;;  %s1044_s26 = sphi %s1100_s26, %s1265_s26   ;;  %s1040_s25 = sphi %s1098_s25, %s1264_s25   ;;  %s1036_s24 = sphi %s1096_s24, %s1263_s24  }
   0x5   : > { %s1121_s30 = sadd.s32 1, %s1048_s27   ;;  %s180_s8 = sadd.s32 1, %s1044_s26 }
   0x6   : > { %s177_s9 = ssub.s32 %s1048_s27, %s1121_s30  ;;  %p190_p0 = scmp.ne.s32.totalorder %s1044_s26, %s1040_s25 }
   0x7   : > { %p178_p1 = scmp.eq.s32.totalorder %s177_s9, 0  ;;  %p191_p2 = scmp.eq.s32.totalorder %s1117_s28, 1 }
   0x8   : > { %p196_p3 = scmp.ne.s32.totalorder %s1040_s25, %s1036_s24  ;;  %p197_p4 = scmp.eq.s32.totalorder %s757_s29, 1 }
   0x9   : > { %s1132_s10 = scalar_select %p178_p1, %s1044_s26, %s180_s8  }
   0xa   : > { %p1134_p5 = por %p191_p2, %p190_p0  ;;  %p1138_p6 = por %p197_p4, %p196_p3 }
   0xb   : > { %p758_p7 = scmp.ge.s32.totalorder %s1048_s27, 1  ;;  %p204_p8 = scmp.lt.s32.totalorder %s1048_s27, 3 }
   0xc   : > { %s1260_s12 = scalar_select %p1138_p6, 1, 0 }
   0xd   : > { %p885_p9 = scmp.eq.s32.totalorder %s1117_s28, 0  ;;  %p1145_p10 = pnand %p758_p7, %p204_p8 }
   0xe   : > { %s1050_s14 = smov [#allocation2]  }
   0xf   : > { %s228_s15 = sshll.u32 %s1050_s14, 4  ;;  %p877_p11 = pneg %p1145_p10  ;;  %s229_s15 = int_to_ptr.vmem [resolvable:$true] %s228_s15 }
  0x10   : > { %s969_s16 = scalar_lea.vmem %s229_s15, 1024  ;;  %p977_p3 = scmp.lt.s32.totalorder %s229_s15, %s229_s15 }
  0x11   : > { %p878_p12 = pnand %p885_p9, %p877_p11  ;;  %p970_p0 = scmp.ne.s32.totalorder %s229_s15, %s969_s16 }
  0x12   : > { %p978_p4 = scmp.lt.s32.totalorder %s969_s16, %s969_s16 }
  0x13   : > { %p960_p13 = pneg %p878_p12 }
  0x14   : > { %p979_p6 = por %p978_p4, %p977_p3 }
  0x15   : > { %p972_p1 = pnand %p970_p0, %p960_p13 }
  0x17   : > { %p973_p2 = pneg %p972_p1 }
  0x19   : > { %p980_p7 = pnand %p979_p6, %p973_p2 }
  0x1b   : > { %983 = shalt.err (!%p980_p7)
}
  0x1c   : > { %s1051_s17 = smov 64   ;;  %s1052_s18 = smov 4  }
  0x1d   : > { %880 = dma.hbm_to_vmem [thread:$0]  (!%p878_p12), %s1256_s5, 1024, %s229_s15, [#allocation3], %s1051_s17, %s1051_s17, %s1052_s18  }
  0x1e   : > { %256 = sbr.rel (%p1145_p10) target bundleno = 711 (0x2c7), region = 48 }
  0x23   : > { %1027 = dma.done.wait (%p885_p9), [#allocation3], 1024  }
  0x24   : > { %1029 = vsyncadd (%p885_p9), [#allocation3], 4294966272  ;;  %s764_s21 = sshll.u32 %s1117_s28, 2  ;;  %v925_v0 = vld [vmem:[%s1252_s1] sm:$0xff]   ;;  %vm317_vm0 = vcmask 130048   ;;  %v926_v7 = vld [vmem:[%s1254_s3 + $0x38] sm:$0xff]  }
  0x25   : > { %p289_p8 = scmp.lt.s32.totalorder %s764_s21, 7  ;;  %825 = vmatprep.subr.bf16.mxu0 %v925_v0  ;;  %831 = vmatprep.subr.bf16.mxu1 %v926_v7  ;;  %v927_v8 = vld [vmem:[%s1254_s3 + $0x30] sm:$0xff]   ;;  %v928_v9 = vld [vmem:[%s1254_s3 + $0x28] sm:$0xff]   ;;  %v929_v10 = vld [vmem:[%s1254_s3 + $0x20] sm:$0xff]   ;;  %s285_s20 = sand.u32 1, %s1040_s25  }
  0x26   : > { %826 = vmatpush3.bf16.msra.mxu0 %v925_v0  ;;  %832 = vmatpush3.bf16.msra.mxu1 %v926_v7  ;;  %v930_v11 = vld [vmem:[%s1254_s3 + $0x18] sm:$0xff]   ;;  %v931_v12 = vld [vmem:[%s1254_s3 + $0x10] sm:$0xff]   ;;  %v932_v13 = vld [vmem:[%s1254_s3 + $0x8] sm:$0xff]   ;;  %s801_s9 = sshll.u32 %s1117_s28, 9  ;;  %s1211_s16 = scalar_lea.sflag [#allocation4], %s285_s20 }
  0x27   : > { %s1268_s21 = smov (!%p289_p8, %s764_s21), 7  ;;  %833 = vmatprep.subr.bf16.mxu1 %v927_v8  ;;  %v933_v14 = vld [vmem:[%s1254_s3] sm:$0xff]   ;;  %v934_v46 = vld [vmem:[#allocation2 + $0x38] sm:$0xff]   ;;  %v935_v47 = vld [vmem:[#allocation2 + $0x30] sm:$0xff]   ;;  %s1209_s15 = scalar_lea.hbm %s1258_s7, %s801_s9 }
  0x28   : > { %s765_s22 = sshll.u32 %s1268_s21, 3  ;;  %v766_v15 = vld [vmem:[%s1253_s2] ss:$0 sm:$0xff]  ;;  %851 = vmatprep.subr.bf16.mxu0 %v934_v46  ;;  %v936_v48 = vld [vmem:[#allocation2 + $0x28] sm:$0xff]   ;;  %v938_v50 = vld [vmem:[#allocation2 + $0x18] sm:$0xff]   ;;  %s763_s21 = sshll.u32 %s285_s20, 5 }
  0x29   : > { %s292_s8 = scalar_lea.vmem %s1251_s0, %s765_s22  ;;  %v937_v49 = vld [vmem:[#allocation2 + $0x20] sm:$0xff]   ;;  %v939_v51 = vld [vmem:[#allocation2 + $0x10] sm:$0xff]   ;;  %v940_v52 = vld [vmem:[#allocation2 + $0x8] sm:$0xff]   ;;  %s287_s29 = scalar_lea.vmem [#allocation5], %s763_s21 }
  0x2a   : > { %v296_v1 = vld [vmem:[%s292_s8] sm:$0xff]  ;;  %v297_v2 = vld [vmem:[%s292_s8 + $0x8] sm:$0xff]  ;;  %v298_v3 = vld [vmem:[%s292_s8 + $0x10] sm:$0xff]  ;;  %834 = vmatpush3.bf16.msra.mxu1 %v927_v8  ;;  %s1053_s17 = smov [#allocation5]  }
  0x2b   : > { %v300_v4 = vpack.c.bf16 %v297_v2, %v296_v1  ;;  %v299_v5 = vld [vmem:[%s292_s8 + $0x18] sm:$0xff]  ;;  %835 = vmatprep.subr.bf16.mxu1 %v928_v9  ;;  %v941_v53 = vld [vmem:[#allocation2] sm:$0xff]   ;;  %s683_s8 = sshll.u32 %s287_s29, 4  ;;  %s988_s18 = sshll.u32 %s1053_s17, 4  ;;  %s1204_s8 = int_to_ptr.vmem [resolvable:$true] %s683_s8  ;;  %s989_s18 = int_to_ptr.vmem [resolvable:$false] %s988_s18 }
  0x2c   : > { %v301_v6 = vpack.c.bf16 %v299_v5, %v298_v3  ;;  %v774_v54 = vld [vmem:[%s1255_s4] ss:$0 sm:$0xff]  ;;  %s984_s28 = scalar_lea.vmem %s1204_s8, 512  ;;  %s990_s19 = scalar_lea.vmem %s989_s18, 1024 }
  0x2d   : > { %827 = vmatprep.mubr.msk.bf16.mxu0 %vm317_vm0, %v300_v4  ;;  %p985_p6 = scmp.ne.s32.totalorder %s1204_s8, %s984_s28  ;;  %p991_p11 = scmp.lt.s32.totalorder %s1204_s8, %s989_s18 }
  0x2e   : > { %828 = vmatmul.mubr.msk.bf16.vlgmr.msra.gmra.mxu0 %vm317_vm0, %v301_v6  ;;  %836 = vmatpush3.bf16.msra.mxu1 %v928_v9  ;;  %p992_p12 = scmp.lt.s32.totalorder %s990_s19, %s984_s28 }
  0x2f   : > { %837 = vmatprep.subr.bf16.mxu1 %v929_v10  ;;  %852 = vmatpush3.bf16.msra.mxu0 %v934_v46  ;;  %p986_p9 = pnand %p985_p6, %p1134_p5 }
  0x30   : > { %853 = vmatprep.subr.bf16.mxu0 %v935_v47  ;;  %p993_p13 = por %p992_p12, %p991_p11 }
  0x31   : > { %p987_p10 = pneg %p986_p9 }
  0x32   : > { %838 = vmatpush3.bf16.msra.mxu1 %v929_v10 }
  0x33   : > { %839 = vmatprep.subr.bf16.mxu1 %v930_v11  ;;  %854 = vmatpush3.bf16.msra.mxu0 %v935_v47  ;;  %p994_p0 = pnand %p993_p13, %p987_p10 }
  0x34   : > { %855 = vmatprep.subr.bf16.mxu0 %v936_v48 }
  0x36   : > { %840 = vmatpush3.bf16.msra.mxu1 %v930_v11 }
  0x37   : > { %841 = vmatprep.subr.bf16.mxu1 %v931_v12  ;;  %856 = vmatpush3.bf16.msra.mxu0 %v936_v48 }
  0x38   : > { %857 = vmatprep.subr.bf16.mxu0 %v937_v49 }
  0x3a   : > { %842 = vmatpush3.bf16.msra.mxu1 %v931_v12 }
  0x3b   : > { %843 = vmatprep.subr.bf16.mxu1 %v932_v13  ;;  %858 = vmatpush3.bf16.msra.mxu0 %v937_v49 }
  0x3c   : > { %859 = vmatprep.subr.bf16.mxu0 %v938_v50 }
  0x3e   : > { %844 = vmatpush3.bf16.msra.mxu1 %v932_v13 }
  0x3f   : > { %845 = vmatprep.subr.bf16.mxu1 %v933_v14  ;;  %860 = vmatpush3.bf16.msra.mxu0 %v938_v50 }
  0x40   : > { %861 = vmatprep.subr.bf16.mxu0 %v939_v51 }
  0x42   : > { %846 = vmatpush3.bf16.msra.mxu1 %v933_v14 }
  0x43   : > { %862 = vmatpush3.bf16.msra.mxu0 %v939_v51 }
  0x44   : > { %863 = vmatprep.subr.bf16.mxu0 %v940_v52 }
  0x47   : > { %864 = vmatpush3.bf16.msra.mxu0 %v940_v52 }
  0x48   : > { %865 = vmatprep.subr.bf16.mxu0 %v941_v53 }
  0x4b   : > { %866 = vmatpush3.bf16.msra.mxu0 %v941_v53 }
  0xee   : > { %v829_v16 = vpop.f32.mrf.mxu0 }
  0xef   : > { %v367_v17 = vadd.f32 %v829_v16, %v766_v15 }
  0xf0   : > { %v358_v18 = vpop.f32.mrf.mxu0 }
  0xf1   : > { %v381_v19 = vmul.f32 1.442695, %v367_v17  ;;  %v359_v20 = vadd.f32 %v766_v15, %v358_v18  ;;  %vm375_vm4 = vcmp.ge.f32.partialorder %v367_v17, 0.0 }
  0xf2   : > { %v830_v21 = vpop.f32.mrf.mxu0 }
  0xf3   : > { %v377_v22 = vmul.f32 1.442695, %v359_v20  ;;  %v370_v23 = vadd.f32 %v830_v21, %v766_v15  ;;  %942 = vpow2.f32 %v381_v19  ;;  %vm373_vm2 = vcmp.ge.f32.partialorder %v359_v20, 0.0  ;;  %v787_v21 = vld [vmem:[%s1257_s6] ss:$0 sm:$0xff] }
  0xf4   : > { %v361_v24 = vpop.f32.mrf.mxu0 }
  0xf5   : > { %944 = vpow2.f32 %v377_v22  ;;  %v383_v25 = vmul.f32 1.442695, %v370_v23  ;;  %v362_v26 = vadd.f32 %v766_v15, %v361_v24  ;;  %vm376_vm1 = vcmp.ge.f32.partialorder %v370_v23, 0.0 }
  0xf7   : > { %946 = vpow2.f32 %v383_v25  ;;  %v379_v27 = vmul.f32 1.442695, %v362_v26  ;;  %vm374_vm3 = vcmp.ge.f32.partialorder %v362_v26, 0.0 }
  0xf9   : > { %948 = vpow2.f32 %v379_v27 }
 0x100   : > { %v943_v28 = vpop.eup %942 }
 0x101   : > { %v772_v32 = vadd.f32 -1.0, %v943_v28 }
 0x102   : > { %v945_v29 = vpop.eup %944 }
 0x103   : > { %v770_v30 = vadd.f32 -1.0, %v945_v29  ;;  %v391_v38 = vmul.f32 0.15, %v772_v32 }
 0x104   : > { %v947_v31 = vpop.eup %946 }
 0x105   : > { %v773_v33 = vadd.f32 -1.0, %v947_v31  ;;  %v389_v36 = vmul.f32 0.15, %v770_v30  ;;  %v395_v44 = vsel %vm375_vm4, %v367_v17, %v391_v38 }
 0x106   : > { %v949_v34 = vpop.eup %948 }
 0x107   : > { %v771_v35 = vadd.f32 -1.0, %v949_v34  ;;  %v392_v37 = vmul.f32 0.15, %v773_v33  ;;  %v393_v41 = vsel %vm373_vm2, %v359_v20, %v389_v36 }
 0x109   : > { %v390_v39 = vmul.f32 0.15, %v771_v35  ;;  %v396_v40 = vsel %vm376_vm1, %v370_v23, %v392_v37 }
 0x10a   : > { %v398_v45 = vpack.c.bf16 %v396_v40, %v395_v44 }
 0x10b   : > { %v394_v42 = vsel %vm374_vm3, %v362_v26, %v390_v39 }
 0x10c   : > { %v397_v43 = vpack.c.bf16 %v394_v42, %v393_v41 }
 0x10e   : > { %847 = vmatprep.mubr.bf16.mxu1 %v397_v43 }
 0x10f   : > { %848 = vmatmul.mubr.bf16.vlgmr.msra.gmra.mxu1 %v398_v45 }
 0x1cf   : > { %v849_v55 = vpop.f32.mrf.mxu1 }
 0x1d0   : > { %v513_v56 = vadd.f32 %v849_v55, %v774_v54 }
 0x1d1   : > { %v504_v57 = vpop.f32.mrf.mxu1 }
 0x1d2   : > { %v527_v58 = vmul.f32 1.442695, %v513_v56  ;;  %v505_v59 = vadd.f32 %v774_v54, %v504_v57  ;;  %vm521_vm8 = vcmp.ge.f32.partialorder %v513_v56, 0.0 }
 0x1d3   : > { %v850_v60 = vpop.f32.mrf.mxu1 }
 0x1d4   : > { %v523_v61 = vmul.f32 1.442695, %v505_v59  ;;  %v516_v62 = vadd.f32 %v850_v60, %v774_v54  ;;  %950 = vpow2.f32 %v527_v58  ;;  %vm519_vm6 = vcmp.ge.f32.partialorder %v505_v59, 0.0 }
 0x1d5   : > { %v507_v63 = vpop.f32.mrf.mxu1 }
 0x1d6   : > { %952 = vpow2.f32 %v523_v61  ;;  %v529_v0 = vmul.f32 1.442695, %v516_v62  ;;  %v508_v1 = vadd.f32 %v774_v54, %v507_v63  ;;  %vm522_vm5 = vcmp.ge.f32.partialorder %v516_v62, 0.0 }
 0x1d8   : > { %954 = vpow2.f32 %v529_v0  ;;  %v525_v2 = vmul.f32 1.442695, %v508_v1  ;;  %vm520_vm7 = vcmp.ge.f32.partialorder %v508_v1, 0.0 }
 0x1da   : > { %956 = vpow2.f32 %v525_v2 }
 0x1e1   : > { %v951_v3 = vpop.eup %950 }
 0x1e2   : > { %v785_v7 = vadd.f32 -1.0, %v951_v3 }
 0x1e3   : > { %v953_v4 = vpop.eup %952 }
 0x1e4   : > { %v783_v5 = vadd.f32 -1.0, %v953_v4  ;;  %v537_v13 = vmul.f32 0.1, %v785_v7 }
 0x1e5   : > { %v955_v6 = vpop.eup %954 }
 0x1e6   : > { %v786_v8 = vadd.f32 -1.0, %v955_v6  ;;  %v535_v12 = vmul.f32 0.1, %v783_v5  ;;  %v541_v18 = vsel %vm521_vm8, %v513_v56, %v537_v13 }
 0x1e7   : > { %v957_v9 = vpop.eup %956 }
 0x1e8   : > { %v538_v10 = vmul.f32 0.1, %v786_v8  ;;  %v784_v11 = vadd.f32 -1.0, %v957_v9  ;;  %v539_v16 = vsel %vm519_vm6, %v505_v59, %v535_v12 }
 0x1ea   : > { %v536_v14 = vmul.f32 0.1, %v784_v11  ;;  %v542_v15 = vsel %vm522_vm5, %v516_v62, %v538_v10 }
 0x1eb   : > { %v544_v20 = vpack.c.bf16 %v542_v15, %v541_v18 }
 0x1ec   : > { %v540_v17 = vsel %vm520_vm7, %v508_v1, %v536_v14 }
 0x1ed   : > { %v543_v19 = vpack.c.bf16 %v540_v17, %v539_v16 }
 0x1ef   : > { %867 = vmatprep.mubr.bf16.mxu0 %v543_v19 }
 0x1f0   : > { %868 = vmatmul.mubr.bf16.vlgmr.msra.gmra.mxu0 %v544_v20 }
 0x2b0   : > { %v869_v22 = vpop.f32.mrf.mxu0 }
 0x2b1   : > { %v659_v23 = vadd.f32 %v869_v22, %v787_v21 }
 0x2b2   : > { %v650_v24 = vpop.f32.mrf.mxu0 }
 0x2b3   : > { %667 = vst [vmem:[%s287_s29 + $0x10] sm:$0xff] %v659_v23  ;;  %v651_v25 = vadd.f32 %v787_v21, %v650_v24 }
 0x2b4   : > { %v870_v26 = vpop.f32.mrf.mxu0 }
 0x2b5   : > { %665 = vst [vmem:[%s287_s29] sm:$0xff] %v651_v25  ;;  %v662_v27 = vadd.f32 %v870_v26, %v787_v21 }
 0x2b6   : > { %v653_v28 = vpop.f32.mrf.mxu0 }
 0x2b7   : > { %668 = vst [vmem:[%s287_s29 + $0x18] sm:$0xff] %v662_v27  ;;  %v654_v29 = vadd.f32 %v787_v21, %v653_v28 }
 0x2b9   : > { %666 = vst [vmem:[%s287_s29 + $0x8] sm:$0xff] %v654_v29 }
 0x2ba   : > { %997 = shalt.err (!%p994_p0)
}
 0x2bb   : > { %s998_s20 = scalar_lea.hbm %s1209_s15, 512  ;;  %s1002_s23 = scalar_lea.hbm %s1258_s7, 1024 }
 0x2bc   : > { %p999_p1 = scmp.ne.s32.totalorder %s1209_s15, %s998_s20  ;;  %p1003_p4 = scmp.lt.s32.totalorder %s1209_s15, %s1258_s7 }
 0x2bd   : > { %p1004_p7 = scmp.lt.s32.totalorder %s1002_s23, %s998_s20 }
 0x2be   : > { %p1000_p2 = pnand %p999_p1, %p1134_p5 }
 0x2bf   : > { %p1005_p8 = por %p1004_p7, %p1003_p4 }
 0x2c0   : > { %p1001_p3 = pneg %p1000_p2 }
 0x2c2   : > { %p1006_p6 = pnand %p1005_p8, %p1001_p3 }
 0x2c4   : > { %1009 = shalt.err (!%p1006_p6)
}
 0x2c5   : > { %s1054_s14 = smov 128   ;;  %s1055_s13 = smov 8  }
 0x2c6   : > { %875 = dma.vmem_to_hbm [thread:$0]  (%p1134_p5), %s1204_s8, 512, %s1209_s15, %s1211_s16, %s1054_s14, %s1054_s14, %s1055_s13  }
 0x2c7 PF: > { %p887_p9 = scmp.ge.s32.totalorder %s1048_s27, 2  ;;  %s698_s28 = sand.u32 1, %s1036_s24  }
 0x2c8   : > { %p1262_p10 = scmp.ne.s32.totalorder %s1260_s12, 0  ;;  %s699_s17 = scalar_lea.sflag [#allocation4], %s698_s28 }
 0x2ca   : > { %p882_p11 = pnand %p887_p9, %p1262_p10 }
 0x2cc   : > { %p883_p12 = pneg %p882_p11 }
 0x2ce   : > { %1031 = dma.done.wait (%p883_p12), %s699_s17, 512  }
 0x2cf   : > { %1033 = vsyncadd (%p883_p12), %s699_s17, 4294966784  ;;  %p18_p13 = scmp.ge.s32.totalorder %s1121_s30, 4   ;;  %s1263_s24 = smov %s1040_s25 }
 0x2d0   : > { %s1264_s25 = smov %s1044_s26  ;;  %s1265_s26 = smov %s1132_s10 }
 0x2d1   : > { %s1266_s27 = smov %s1121_s30  ;;  %20 = sbr.rel (!%p18_p13) target bundleno = 4 (0x4), region = 88 }
 0x2d6   :  { %704 = vsyncpa [#allocation3], 1 }
 0x2d7   :  { %706 = vsyncpa [#allocation3 + $0x1], 1 }
 0x2d8   :  { %707 = vsyncpa [#allocation4], 1 }
 0x2d9   :  { %709 = vsyncpa [#allocation4 + $0x1], 1 }

</bundles_post_ra>
